<compile_context>
chip_gen: v7x
topology: tpu7x:2x2x1
jax: 0.10.0
libtpu: 0.0.40
codegen_flags: <defaults>
</compile_context>

<pallas_src>
import jax
import jax.numpy as jnp
from jax.experimental import pallas as pl
from jax.experimental.pallas import tpu as pltpu

_SUBLANE = 8  # f32 sublane granularity (second-to-last dim)


def _round_up(v, m):
    return ((v + m - 1) // m) * m


def _vmem_capacity_bytes():
    """Physical VMEM of the local chip; conservative fallback if unavailable."""
    try:
        return int(pltpu.get_tpu_info().vmem_capacity_bytes)
    except Exception:
        return 64 * 1024 * 1024  # v7x-sized fallback, safe on all generations


def _pick_batch_tile(batch, k_dim, m_dim, budget_bytes):
    """Largest batch tile (multiple of 8) such that the resident stacked weight
    (counted at 2x for default double-buffering) plus double-buffered
    activation/output tiles fit the VMEM budget."""
    itemsize = 4  # f32
    weight_bytes = 2 * k_dim * m_dim * itemsize
    tb = _round_up(min(1024, _round_up(batch, _SUBLANE)), _SUBLANE)
    while tb > _SUBLANE and \
            weight_bytes + 2 * tb * (k_dim + m_dim) * itemsize > budget_bytes:
        tb = _round_up(tb // 2, _SUBLANE)
    return max(tb, _SUBLANE)


def _sample_kernel(xe_ref, w_ref, y_ref):
    # Single fused MXU pass: [TB, N+M] @ [N+M, M] -> [TB, M], f32 accumulation.
    y_ref[...] = jnp.dot(
        xe_ref[...], w_ref[...],
        preferred_element_type=jnp.float32,
        precision=jax.lax.Precision.HIGHEST,
    ).astype(y_ref.dtype)


def linear_gaussian_sample(xe, W):
    """y = [x | eps] @ [[A^T], [S^T]] = x @ A^T + eps @ S^T.

    xe: [B, N+M] float32 fused activation slab (x and eps concatenated)
    W:  [N+M, M] float32 stacked weight (rows 0..N = A^T, rows N.. = S^T)
    returns: [B, M] float32
    """
    B, K = xe.shape
    Kw, M = W.shape
    assert K == Kw

    capacity = _vmem_capacity_bytes()
    vmem_limit = max(32 * 1024 * 1024, int(capacity * 0.85))
    budget = vmem_limit - 2 * 1024 * 1024

    TB = _pick_batch_tile(B, K, M, budget)
    grid = (pl.cdiv(B, TB),)

    return pl.pallas_call(
        _sample_kernel,
        out_shape=jax.ShapeDtypeStruct((B, M), jnp.float32),
        grid_spec=pltpu.PrefetchScalarGridSpec(
            num_scalar_prefetch=0,
            grid=grid,
            in_specs=[
                # activation tile: pipelined over the batch axis
                pl.BlockSpec((TB, K), lambda i: (i, 0)),
                # stacked weight: constant index -> VMEM resident across the grid
                pl.BlockSpec((K, M), lambda i: (0, 0)),
            ],
            out_specs=pl.BlockSpec((TB, M), lambda i: (i, 0)),
        ),
        compiler_params=pltpu.CompilerParams(
            dimension_semantics=("parallel",),   # independent batch tiles
            vmem_limit_bytes=vmem_limit,
        ),
    )(xe, W)


class LinearModelWithGaussianNoise:
    """Concrete instantiation of the abstract PyTorch base class."""

    def __init__(self, x_dim, y_dim, key):
        k_a, k_s = jax.random.split(key)
        self.x_dim, self.y_dim = x_dim, y_dim
        # Deterministic synthetic parameters (the abstract base only defines a
        # dummy parameter; A and Sigma^{1/2} belong to the concrete subclass).
        self.A = jax.random.normal(k_a, (y_dim, x_dim), jnp.float32) / jnp.sqrt(x_dim)
        self.sqrtSigma = (0.1 * jnp.eye(y_dim, dtype=jnp.float32)
                          + 0.01 * jax.random.normal(k_s, (y_dim, y_dim), jnp.float32))
        self.dummy_parameter = jnp.zeros((1,), jnp.float32)  # parity w/ torch module

        # Stack the static weights ONCE so the kernel is a single GEMM:
        #   y = [x | eps] @ [[A^T], [S^T]]
        self._W = jnp.concatenate([self.A.T, self.sqrtSigma.T], axis=0)  # (N+M, M)

    def forward(self, x, noise_key):
        B = x.shape[0]
        # epsilon = randn_like(Ax): standard Gaussian, same stream as the ref check.
        eps = jax.random.normal(noise_key, (B, self.y_dim), jnp.float32)
        # Fused activation slab [x | eps]: matches the stacked weight layout.
        xe = jnp.concatenate([x, eps], axis=-1)
        return linear_gaussian_sample(xe, self._W)

    def fix_state(self):
        # TODO(synk): abstract in the reference; no state to fix for this synthetic model.
        pass


if __name__ == "__main__":
    key = jax.random.PRNGKey(0)
    k_param, k_x, k_noise = jax.random.split(key, 3)

    B, N, M = 8, 32, 16  # batch, x_dim, y_dim (small demo shapes)
    model = LinearModelWithGaussianNoise(x_dim=N, y_dim=M, key=k_param)
    x = jax.random.normal(k_x, (B, N), jnp.float32)

    y = model.forward(x, k_noise)
    jax.block_until_ready(y)

    # correctness check against plain-JAX reference (same eps stream, same precision)
    eps = jax.random.normal(k_noise, (B, M), jnp.float32)
    y_ref = (jnp.dot(x, model.A.T, precision=jax.lax.Precision.HIGHEST)
             + jnp.dot(eps, model.sqrtSigma.T, precision=jax.lax.Precision.HIGHEST))
    assert y.shape == (B, M)
    assert jnp.allclose(y, y_ref, atol=1e-4, rtol=1e-4), \
        float(jnp.max(jnp.abs(y - y_ref)))

    print("KERNEL_OK")
</pallas_src>

<mosaic_0001>
module attributes {stable_mosaic.version = 11 : i64} {
  func.func @_sample_kernel(%arg0: i32, %arg1: memref<8x48xf32, #tpu.memory_space<vmem>>, %arg2: memref<48x16xf32, #tpu.memory_space<vmem>>, %arg3: memref<8x16xf32, #tpu.memory_space<vmem>>) attributes {dimension_semantics = [#tpu.dimension_semantics<parallel>], iteration_bounds = array<i64: 1>, scalar_prefetch = 0 : i64, scratch_operands = 0 : i64, tpu.core_type = #tpu.core_type<tc>, window_params = [{transform_indices = @transform_0, window_bounds = array<i64: 8, 48>}, {pipeline_mode = #tpu.pipeline_mode<synchronous>, transform_indices = @transform_1, window_bounds = array<i64: 48, 16>}, {transform_indices = @transform_2, window_bounds = array<i64: 8, 16>}]} {
    %c0 = arith.constant 0 : index
    %c0_0 = arith.constant 0 : index
    %0 = vector.load %arg1[%c0, %c0_0] : memref<8x48xf32, #tpu.memory_space<vmem>>, vector<8x48xf32>
    %c0_1 = arith.constant 0 : index
    %c0_2 = arith.constant 0 : index
    %1 = vector.load %arg2[%c0_1, %c0_2] : memref<48x16xf32, #tpu.memory_space<vmem>>, vector<48x16xf32>
    %cst = arith.constant dense<0.000000e+00> : vector<8x16xf32>
    %2 = tpu.matmul %0, %1, %cst {dimension_numbers = #tpu.dot_dimension_numbers<[1], [0], [0], [1], [0, 0, 1, 1], [], []>, precision = #tpu.contract_precision<fp32>} : vector<8x48xf32>, vector<48x16xf32>, vector<8x16xf32> -> vector<8x16xf32>
    %c0_3 = arith.constant 0 : index
    %c0_4 = arith.constant 0 : index
    %3 = vector.load %arg3[%c0_3, %c0_4] : memref<8x16xf32, #tpu.memory_space<vmem>>, vector<8x16xf32>
    tpu.vector_store %arg3[%c0_3, %c0_4], %2 {strides = array<i32>} : memref<8x16xf32, #tpu.memory_space<vmem>>, vector<8x16xf32>,
    return
  }
  func.func @transform_0(%arg0: i32) -> (i32, i32) {
    %c0_i32 = arith.constant 0 : i32
    %c0_i32_0 = arith.constant 0 : i32
    return %arg0, %c0_i32 : i32, i32
  }
  func.func @transform_1(%arg0: i32) -> (i32, i32) {
    %c0_i32 = arith.constant 0 : i32
    %c0_i32_0 = arith.constant 0 : i32
    %c0_i32_1 = arith.constant 0 : i32
    return %c0_i32, %c0_i32_0 : i32, i32
  }
  func.func @transform_2(%arg0: i32) -> (i32, i32) {
    %c0_i32 = arith.constant 0 : i32
    %c0_i32_0 = arith.constant 0 : i32
    return %arg0, %c0_i32 : i32, i32
  }
}

</mosaic_0001>

<bundles_post_ra>
// kernel: tpu_custom_call.1
= control target key start
LH: loop header
LB: loop body
LE: loop exit
PB: predicated region body
PF: predicated region fallthrough
CT: control target
= control target key end

     0   :  { %v773_v3 = vmov 0.0|0.0   ;;  %vm774_vm0 = vmmov 0   ;;  %v775_v13 = vmov 0.0   ;;  %vm19_vm1 = vcmask 392192   ;;  %s901_s0 = inlined_call_operand.vmem [shape: f32[8,48], index: 0, kind: input, shape index: {}]   ;;  %s902_s1 = inlined_call_operand.vmem [shape: f32[48,16], index: 1, kind: input, shape index: {}]   ;;  %s903_s2 = inlined_call_operand.hbm [shape: f32[8,16], index: 2, kind: output, shape index: {}]  }
   0x1   :  { %v13_v0 = vld [vmem:[%s902_s1] sm:$0xff]  ;;  %v14_v1 = vld [vmem:[%s902_s1 + $0x8] sm:$0xff]  ;;  %v15_v2 = vld [vmem:[%s902_s1 + $0x10] sm:$0xff]  ;;  %682 = vmatprep.subr.bf16.mxu1 %v773_v3  ;;  %709 = vmatprep.subr.bf16.mxu0 %v773_v3 }
   0x2   :  { %v24_v4 = vand.u32 4294901760, %v13_v0  ;;  %v27_v5 = vand.u32 4294901760, %v14_v1  ;;  %v16_v6 = vld [vmem:[%s902_s1 + $0x18] sm:$0xff]  ;;  %v30_v7 = vand.u32 4294901760, %v15_v2  ;;  %v17_v8 = vld [vmem:[%s902_s1 + $0x20] sm:$0xff]  ;;  %v18_v9 = vld [vmem:[%s902_s1 + $0x28] sm:$0xff]  ;;  %604 = vmatprep.mubr.msk.f32.mxu1 %vm774_vm0, %v775_v13  ;;  %649 = vmatprep.mubr.msk.f32.mxu0 %vm774_vm0, %v775_v13 }
   0x3   :  { %v33_v10 = vand.u32 4294901760, %v16_v6  ;;  %v36_v11 = vand.u32 4294901760, %v17_v8  ;;  %v39_v12 = vand.u32 4294901760, %v18_v9  ;;  %v12_v14 = vld [vmem:[%s901_s0] sm:$0xff] }
   0x4   :  { %v819_v15 = vpack.c.bf16 %v27_v5, %v24_v4  ;;  %v821_v16 = vsub.f32 %v13_v0, %v24_v4  ;;  %v823_v17 = vsub.f32 %v14_v1, %v27_v5  ;;  %v825_v18 = vsub.f32 %v15_v2, %v30_v7 }
   0x5   :  { %7 = vsyncpa [#allocation3], 0  ;;  %v827_v19 = vpack.c.bf16 %v33_v10, %v30_v7  ;;  %v829_v20 = vsub.f32 %v16_v6, %v33_v10  ;;  %v831_v21 = vsub.f32 %v17_v8, %v36_v11  ;;  %v835_v22 = vsub.f32 %v18_v9, %v39_v12  ;;  %s776_s0 = smov [#allocation2]  }
   0x6   :  { %684 = vmatpush3.bf16.msra.mxu1 %v819_v15  ;;  %711 = vmatpush3.bf16.msra.mxu0 %v819_v15  ;;  %v21_v23 = vsel %vm19_vm1, %v12_v14, 0  ;;  %v107_v24 = vand.u32 4294901760, %v821_v16  ;;  %v114_v25 = vand.u32 4294901760, %v823_v17  ;;  %v121_v27 = vand.u32 4294901760, %v825_v18  ;;  %s542_s1 = sshll.u32 %s776_s0, 4  ;;  %s543_s1 = int_to_ptr.vmem [resolvable:$true] %s542_s1 }
   0x7   :  { %685 = vmatprep.subr.bf16.mxu1 %v773_v3  ;;  %712 = vmatprep.subr.bf16.mxu0 %v773_v3  ;;  %v841_v26 = vand.u32 4294901760, %v21_v23  ;;  %v128_v28 = vand.u32 4294901760, %v829_v20  ;;  %v689_v31 = vpack.c.bf16 %v39_v12, %v36_v11  ;;  %v135_v33 = vand.u32 4294901760, %v831_v21  ;;  %s749_s23 = scalar_lea.vmem %s543_s1, 128  ;;  %p754_p1 = scmp.lt.s32.totalorder %s543_s1, %s543_s1 }
   0x8   :  { %v108_v29 = vsub.f32 %v821_v16, %v107_v24  ;;  %v115_v30 = vsub.f32 %v823_v17, %v114_v25  ;;  %v142_v34 = vand.u32 4294901760, %v835_v22  ;;  %v122_v37 = vsub.f32 %v825_v18, %v121_v27  ;;  %p750_p0 = scmp.ne.s32.totalorder %s543_s1, %s749_s23  ;;  %p755_p2 = scmp.lt.s32.totalorder %s749_s23, %s749_s23 }
   0x9   :  { %v95_v32 = vsub.f32 %v21_v23, %v841_v26  ;;  %v129_v38 = vsub.f32 %v829_v20, %v128_v28  ;;  %v719_v41 = vpack.c.bf16 %v114_v25, %v107_v24  ;;  %v136_v42 = vsub.f32 %v831_v21, %v135_v33 }
   0xa   :  { %687 = vmatpush3.bf16.msra.mxu1 %v827_v19  ;;  %714 = vmatpush3.bf16.msra.mxu0 %v827_v19  ;;  %v109_v35 = vand.u32 4294901760, %v108_v29  ;;  %v116_v36 = vand.u32 4294901760, %v115_v30  ;;  %v123_v44 = vand.u32 4294901760, %v122_v37  ;;  %v143_v46 = vsub.f32 %v835_v22, %v142_v34  ;;  %p756_p3 = por %p755_p2, %p754_p1 }
   0xb   :  { %688 = vmatprep.subr.bf16.mxu1 %v773_v3  ;;  %715 = vmatprep.subr.bf16.mxu0 %v773_v3  ;;  %v96_v39 = vand.u32 4294901760, %v95_v32  ;;  %v130_v45 = vand.u32 4294901760, %v129_v38  ;;  %v722_v49 = vpack.c.bf16 %v128_v28, %v121_v27  ;;  %v137_v50 = vand.u32 4294901760, %v136_v42 }
   0xc   :  { %v692_v43 = vpack.c.bf16 %v116_v36, %v109_v35  ;;  %v144_v51 = vand.u32 4294901760, %v143_v46  ;;  %v725_v53 = vpack.c.bf16 %v142_v34, %v135_v33  ;;  %v701_v54 = vpack.c.bf16 %v823_v17, %v821_v16  ;;  %p757_p4 = pnand %p756_p3, %p750_p0 }
   0xd   :  { %v97_v40 = vsub.f32 %v95_v32, %v96_v39  ;;  %v695_v48 = vpack.c.bf16 %v130_v45, %v123_v44  ;;  %v704_v55 = vpack.c.bf16 %v829_v20, %v825_v18  ;;  %v707_v56 = vpack.c.bf16 %v835_v22, %v831_v21 }
   0xe   :  { %690 = vmatpush3.bf16.msra.mxu1 %v689_v31  ;;  %717 = vmatpush3.bf16.msra.mxu0 %v689_v31  ;;  %v698_v52 = vpack.c.bf16 %v144_v51, %v137_v50  ;;  %vm534_vm2 = vcmask 130048  }
   0xf   :  { %691 = vmatprep.subr.bf16.mxu1 %v773_v3  ;;  %718 = vmatprep.subr.bf16.mxu0 %v773_v3  ;;  %v98_v47 = vand.u32 4294901760, %v97_v40 }
  0x11   :  { %605 = vmatmul.mubr.f32.vlgmr.msra.gmra.mrb[0].mxu1 %v98_v47  ;;  %650 = vmatmul.mubr.f32.vlgmr.msra.gmra.mrb[0].mxu0 %v96_v39 }
  0x12   :  { %693 = vmatpush3.bf16.msra.mxu1 %v692_v43  ;;  %720 = vmatpush3.bf16.msra.mxu0 %v719_v41 }
  0x13   :  { %694 = vmatprep.subr.bf16.mxu1 %v773_v3  ;;  %721 = vmatprep.subr.bf16.mxu0 %v773_v3 }
  0x14   :  { %619 = vmatprep.mubr.msk.f32.mxu1 %vm774_vm0, %v775_v13  ;;  %664 = vmatprep.mubr.msk.f32.mxu0 %vm774_vm0, %v775_v13 }
  0x16   :  { %696 = vmatpush3.bf16.msra.mxu1 %v695_v48  ;;  %723 = vmatpush3.bf16.msra.mxu0 %v722_v49 }
  0x17   :  { %697 = vmatprep.subr.bf16.mxu1 %v773_v3  ;;  %724 = vmatprep.subr.bf16.mxu0 %v773_v3 }
  0x1a   :  { %699 = vmatpush3.bf16.msra.mxu1 %v698_v52  ;;  %726 = vmatpush3.bf16.msra.mxu0 %v725_v53 }
  0x1b   :  { %700 = vmatprep.subr.bf16.mxu1 %v773_v3  ;;  %727 = vmatprep.subr.bf16.mxu0 %v773_v3 }
  0x1d   :  { %620 = vmatmul.mubr.f32.vlgmr.msra.gmra.mrb[0].mxu1 %v841_v26  ;;  %665 = vmatmul.mubr.f32.vlgmr.msra.gmra.mrb[0].mxu0 %v841_v26 }
  0x1e   :  { %702 = vmatpush3.bf16.msra.mxu1 %v701_v54  ;;  %729 = vmatpush3.bf16.msra.mxu0 %v819_v15 }
  0x1f   :  { %703 = vmatprep.subr.bf16.mxu1 %v773_v3  ;;  %730 = vmatprep.subr.bf16.mxu0 %v773_v3 }
  0x20   :  { %634 = vmatprep.mubr.msk.f32.mxu1 %vm774_vm0, %v775_v13  ;;  %679 = vmatprep.mubr.msk.f32.mxu0 %vm774_vm0, %v775_v13 }
  0x22   :  { %705 = vmatpush3.bf16.msra.mxu1 %v704_v55  ;;  %732 = vmatpush3.bf16.msra.mxu0 %v827_v19 }
  0x23   :  { %706 = vmatprep.subr.bf16.mxu1 %v773_v3  ;;  %733 = vmatprep.subr.bf16.mxu0 %v773_v3 }
  0x26   :  { %708 = vmatpush3.bf16.msra.mxu1 %v707_v56  ;;  %735 = vmatpush3.bf16.msra.mxu0 %v689_v31 }
  0x29   :  { %635 = vmatmul.mubr.f32.vlgmr.msra.gmra.mrb[0].mxu1 %v95_v32  ;;  %680 = vmatmul.mubr.f32.vlgmr.msra.gmra.mrb[0].mxu0 %v841_v26 }
  0xfc   :  { %v285_v57 = vpop.f32.mrb[0].mxu1  ;;  %v530_v58 = vpop.f32.mrb[0].mxu0 }
  0xfd   :  { %v736_v59 = vadd.f32 %v530_v58, %v285_v57  ;;  %v636_v60 = vpop.f32.mrb[1].mxu1  ;;  %v681_v61 = vpop.f32.mrb[1].mxu0 }
  0xff   :  { %535 = vst.msk [vmem:[#allocation2] sm:$0xff] %vm534_vm2, %v736_v59 }
 0x100   :  { %760 = shalt.err (!%p757_p4)
}
 0x101   :  { %s761_s26 = scalar_lea.hbm %s903_s2, 128 }
 0x102   :  { %p762_p5 = scmp.ne.s32.totalorder %s903_s2, %s761_s26  ;;  %p765_p6 = scmp.lt.u32.totalorder %s761_s26, %s903_s2 }
 0x104   :  { %p767_p7 = pnand %p765_p6, %p762_p5 }
 0x106   :  { %770 = shalt.err (!%p767_p7)
}
 0x107   :  { %545 = dma.vmem_to_hbm [thread:$0]  %s543_s1, 128, %s903_s2, [#allocation3]  }
 0x108   :  { %771 = dma.done.wait [#allocation3], 128  }
 0x109   :  { %772 = vsyncadd [#allocation3], 4294967168 }
 0x10a   :  { %549 = vsyncpa [#allocation3], 1 }

</bundles_post_ra>
